<compile_context>
chip_gen: v7x
topology: tpu7x:2x2x1
jax: 0.10.0
libtpu: 0.0.40
codegen_flags: <defaults>
</compile_context>

<pallas_src>
import functools
import math

import jax
import jax.numpy as jnp
import numpy as np
from jax.experimental import pallas as pl
from jax.experimental.pallas import tpu as pltpu

_NEG_BIG = -1e30  # finite "-inf" for the additive causal bias


def _layernorm(v, w, b, eps=1e-5):
    mu = jnp.mean(v, axis=-1, keepdims=True)
    var = jnp.mean((v - mu) ** 2, axis=-1, keepdims=True)
    return (v - mu) * jax.lax.rsqrt(var + eps) * w + b


# -----------------------------------------------------------------------------
# Stage 1: ln_1 + QKV projection, computed once per token tile.
# Outputs Q/K/V as (B, n_head, T, head_dim) bf16 (head-major, scale folded in).
# -----------------------------------------------------------------------------
def qkv_kernel(x_ref, ln1w_ref, ln1b_ref,
               wq_ref, bq_ref, wk_ref, bk_ref, wv_ref, bv_ref,
               q_ref, k_ref, v_ref, *, n_head, head_dim):
    f32, bf16 = jnp.float32, jnp.bfloat16
    x = x_ref[0]                                                  # (tt, C) f32
    h = _layernorm(x, ln1w_ref[...], ln1b_ref[...]).astype(bf16)

    def project_and_store(w_ref, b_ref, out_ref):
        p = jnp.dot(h, w_ref[...], preferred_element_type=f32) + b_ref[...]
        for hh in range(n_head):                                  # head-major store
            out_ref[0, hh] = p[:, hh * head_dim:(hh + 1) * head_dim].astype(bf16)

    project_and_store(wq_ref, bq_ref, q_ref)   # 1/sqrt(hd) folded host-side
    project_and_store(wk_ref, bk_ref, k_ref)
    project_and_store(wv_ref, bv_ref, v_ref)


# -----------------------------------------------------------------------------
# Stage 2: flash-style causal attention over streamed KV tiles + c_proj +
# residual + ln_2 + MLP + residual, fused.  Grid = (B, q-tiles, kv-tiles).
# -----------------------------------------------------------------------------
def attn_mlp_kernel(x_ref, q_ref, k_ref, v_ref,
                    wo_ref, bo_ref, ln2w_ref, ln2b_ref,
                    wfc_ref, bfc_ref, wp_ref, bp_ref,
                    o_ref,
                    m_scr, l_scr, acc_scr,
                    *, tq, tk, n_head, head_dim):
    f32, bf16 = jnp.float32, jnp.bfloat16
    kv = pl.program_id(2)
    n_kv = pl.num_programs(2)
    q_start = pl.program_id(1) * tq
    kv_start = kv * tk

    @pl.when(kv == 0)
    def _init():
        m_scr[...] = jnp.full_like(m_scr, _NEG_BIG)
        l_scr[...] = jnp.zeros_like(l_scr)
        acc_scr[...] = jnp.zeros_like(acc_scr)

    def flash_update(apply_mask):
        def _upd():
            q = q_ref[0]                                   # (nh, tq, hd) bf16
            k = k_ref[0]                                   # (nh, tk, hd) bf16
            v = v_ref[0]                                   # (nh, tk, hd) bf16
            # scores (nh, tq, tk): batched MXU matmul, f32 accumulation
            s = jax.lax.dot_general(q, k, (((2,), (2,)), ((0,), (0,))),
                                    preferred_element_type=f32)
            if apply_mask:  # only diagonal-straddling tiles pay for the mask
                rows = jax.lax.broadcasted_iota(jnp.int32, (tq, tk), 0) + q_start
                cols = jax.lax.broadcasted_iota(jnp.int32, (tq, tk), 1) + kv_start
                s = s + jnp.where(rows >= cols, 0.0, _NEG_BIG).astype(f32)[None]
            m_prev = m_scr[...]
            m_new = jnp.maximum(m_prev, jnp.max(s, axis=-1, keepdims=True))
            alpha = jnp.exp(m_prev - m_new)
            p = jnp.exp(s - m_new)
            l_scr[...] = alpha * l_scr[...] + jnp.sum(p, axis=-1, keepdims=True)
            pv = jax.lax.dot_general(p.astype(bf16), v,
                                     (((2,), (1,)), ((0,), (0,))),
                                     preferred_element_type=f32)
            acc_scr[...] = alpha * acc_scr[...] + pv
            m_scr[...] = m_new
        return _upd

    # Causal tile classification: tiles fully above the diagonal do nothing.
    visible = kv_start <= q_start + tq - 1
    no_mask_needed = kv_start + tk - 1 <= q_start
    pl.when(jnp.logical_and(visible, no_mask_needed))(flash_update(False))
    pl.when(jnp.logical_and(visible, jnp.logical_not(no_mask_needed)))(flash_update(True))

    @pl.when(kv == n_kv - 1)
    def _finalize():
        xq = x_ref[0]                                       # (tq, C) f32 residual
        y = acc_scr[...] * (1.0 / l_scr[...])               # exact reciprocal
        # (nh, tq, hd) -> (tq, C): per-head lane concat (matches torch view)
        y = jnp.concatenate([y[hh] for hh in range(n_head)], axis=-1)
        attn_out = jnp.dot(y.astype(bf16), wo_ref[...],
                           preferred_element_type=f32) + bo_ref[...]
        x1 = xq + attn_out
        h2 = _layernorm(x1, ln2w_ref[...], ln2b_ref[...])
        f = jnp.dot(h2.astype(bf16), wfc_ref[...],
                    preferred_element_type=f32) + bfc_ref[...]
        f = jax.nn.gelu(f, approximate=False)               # exact erf GELU (nn.GELU())
        f = jnp.dot(f.astype(bf16), wp_ref[...],
                    preferred_element_type=f32) + bp_ref[...]
        o_ref[0] = (x1 + f).astype(o_ref.dtype)


# -----------------------------------------------------------------------------
# Host-side helpers
# -----------------------------------------------------------------------------
def _vmem_capacity_bytes():
    try:
        return int(pltpu.get_tpu_info().vmem_capacity_bytes)
    except Exception:
        return 64 * 1024 * 1024  # conservative (v7x-sized) fallback


@functools.lru_cache(maxsize=1)
def _single_buffered_weights_supported():
    """Tiny probe: does this jax/Mosaic build accept pipeline_mode=pl.Buffered(1)?"""
    try:
        def _copy(x_ref, o_ref):
            o_ref[...] = x_ref[...]
        fn = pl.pallas_call(
            _copy,
            out_shape=jax.ShapeDtypeStruct((8, 128), jnp.float32),
            grid=(1,),
            in_specs=[pl.BlockSpec((8, 128), lambda i: (0, 0),
                                   pipeline_mode=pl.Buffered(1))],
            out_specs=pl.BlockSpec((8, 128), lambda i: (0, 0)),
        )
        jax.block_until_ready(fn(jnp.zeros((8, 128), jnp.float32)))
        return True
    except Exception:
        return False


def _weight_spec(arr):
    """Grid-invariant weight: block = full array, constant index."""
    idx = lambda *args, _nd=arr.ndim: (0,) * _nd
    if _single_buffered_weights_supported():
        return pl.BlockSpec(arr.shape, idx, pipeline_mode=pl.Buffered(1))
    return pl.BlockSpec(arr.shape, idx)


def _pick_tile(T, cap):
    for cand in (512, 256, 128, 64, 32, 16, 8):
        if cand <= cap and cand <= T and T % cand == 0:
            return cand
    return T


def transformer_block(x, params, n_head, tq=None, tk=None):
    """x: (B, T, C) f32. Matches Block.forward (past_kv=None, use_cache=False, eval)."""
    B, T, C = x.shape
    assert C % n_head == 0
    hd = C // n_head
    (ln1w, ln1b, wqkv, bqkv, wo, bo, ln2w, ln2b, wfc, bfc, wp, bp) = params

    vmem_cap = _vmem_capacity_bytes()
    big_vmem = vmem_cap >= 100 * 1024 * 1024          # v5e / v6e: 128 MiB physical
    tile_cap = 512 if big_vmem else 256               # keep tq/tk <= 256 on v7x
    if tq is None:
        tq = _pick_tile(T, tile_cap)
    if tk is None:
        tk = _pick_tile(T, tile_cap)
    assert T % tq == 0 and T % tk == 0, "tiles must divide T"

    # Leave headroom below physical VMEM; never exceed ~112 MiB scoped.
    vmem_limit = int(max(min(vmem_cap - 12 * 2**20, 112 * 2**20), 32 * 2**20))

    f32, bf16 = jnp.float32, jnp.bfloat16
    # Split fused QKV; fold 1/sqrt(hd) into the Q projection; bf16 matmul
    # weights (MXU fast path, half the DMA/VMEM); biases / LN params stay f32.
    scale = 1.0 / math.sqrt(hd)
    wq = (wqkv[:, :C] * scale).astype(bf16)
    bq = (bqkv[:, :C] * scale).astype(f32)
    wk = wqkv[:, C:2 * C].astype(bf16)
    bk = bqkv[:, C:2 * C].astype(f32)
    wv = wqkv[:, 2 * C:].astype(bf16)
    bv = bqkv[:, 2 * C:].astype(f32)

    # ---------------- stage 1: ln_1 + QKV (once per token) ----------------
    qkv_weights = (ln1w, ln1b, wq, bq, wk, bk, wv, bv)
    tt = tq
    qkv_fn = pl.pallas_call(
        functools.partial(qkv_kernel, n_head=n_head, head_dim=hd),
        out_shape=(
            jax.ShapeDtypeStruct((B, n_head, T, hd), bf16),
            jax.ShapeDtypeStruct((B, n_head, T, hd), bf16),
            jax.ShapeDtypeStruct((B, n_head, T, hd), bf16),
        ),
        grid_spec=pltpu.PrefetchScalarGridSpec(
            num_scalar_prefetch=0,
            grid=(B, T // tt),
            in_specs=[pl.BlockSpec((1, tt, C), lambda b, ti: (b, ti, 0))]
                     + [_weight_spec(a) for a in qkv_weights],
            out_specs=[pl.BlockSpec((1, n_head, tt, hd),
                                    lambda b, ti: (b, 0, ti, 0))] * 3,
        ),
        compiler_params=pltpu.CompilerParams(
            dimension_semantics=("parallel", "parallel"),
            vmem_limit_bytes=vmem_limit,
        ),
    )
    q_h, k_h, v_h = qkv_fn(x, *qkv_weights)

    # ---------------- stage 2: flash attention + c_proj + MLP ----------------
    def kv_index_map(b, qi, kv):
        # Clamp to the last KV tile that intersects the causal region for this
        # query tile -> tiles fully above the diagonal never trigger a new DMA.
        max_kv = ((qi + 1) * tq - 1) // tk
        return (b, 0, jnp.minimum(kv, max_kv), 0)

    mlp_weights = (wo.astype(bf16), bo.astype(f32), ln2w, ln2b,
                   wfc.astype(bf16), bfc.astype(f32), wp.astype(bf16),
                   bp.astype(f32))

    attn_fn = pl.pallas_call(
        functools.partial(attn_mlp_kernel, tq=tq, tk=tk,
                          n_head=n_head, head_dim=hd),
        out_shape=jax.ShapeDtypeStruct((B, T, C), f32),
        grid_spec=pltpu.PrefetchScalarGridSpec(
            num_scalar_prefetch=0,
            grid=(B, T // tq, T // tk),
            in_specs=[
                pl.BlockSpec((1, tq, C), lambda b, qi, kv: (b, qi, 0)),       # x
                pl.BlockSpec((1, n_head, tq, hd),
                             lambda b, qi, kv: (b, 0, qi, 0)),                # Q
                pl.BlockSpec((1, n_head, tk, hd), kv_index_map),              # K
                pl.BlockSpec((1, n_head, tk, hd), kv_index_map),              # V
            ] + [_weight_spec(a) for a in mlp_weights],
            out_specs=pl.BlockSpec((1, tq, C), lambda b, qi, kv: (b, qi, 0)),
            scratch_shapes=[
                pltpu.VMEM((n_head, tq, 1), f32),    # running max
                pltpu.VMEM((n_head, tq, 1), f32),    # running denom
                pltpu.VMEM((n_head, tq, hd), f32),   # output accumulator
            ],
        ),
        compiler_params=pltpu.CompilerParams(
            dimension_semantics=("parallel", "parallel", "arbitrary"),
            vmem_limit_bytes=vmem_limit,
        ),
    )
    return attn_fn(x, q_h, k_h, v_h, *mlp_weights)


# -----------------------------------------------------------------------------
# Pure-JAX f32 reference mirroring the PyTorch module (eval mode) + init
# -----------------------------------------------------------------------------
def reference_block(x, params, n_head):
    (ln1w, ln1b, wqkv, bqkv, wo, bo, ln2w, ln2b, wfc, bfc, wp, bp) = params
    B, T, C = x.shape
    hd = C // n_head

    h = _layernorm(x, ln1w, ln1b)
    qkv = h @ wqkv + bqkv
    q, k, v = jnp.split(qkv, 3, axis=-1)
    q = q.reshape(B, T, n_head, hd).transpose(0, 2, 1, 3)
    k = k.reshape(B, T, n_head, hd).transpose(0, 2, 1, 3)
    v = v.reshape(B, T, n_head, hd).transpose(0, 2, 1, 3)
    att = jnp.einsum("bhtd,bhsd->bhts", q, k) / math.sqrt(hd)
    mask = jnp.tril(jnp.ones((T, T), bool))
    att = jnp.where(mask[None, None], att, -jnp.inf)
    att = jax.nn.softmax(att, axis=-1)
    y = jnp.einsum("bhts,bhsd->bhtd", att, v)
    y = y.transpose(0, 2, 1, 3).reshape(B, T, C)
    x = x + (y @ wo + bo)
    h2 = _layernorm(x, ln2w, ln2b)
    f = jax.nn.gelu(h2 @ wfc + bfc, approximate=False)
    return x + (f @ wp + bp)


def init_params(key, n_embd):
    """Deterministic GPT-style init. Linear weights stored as (in, out)."""
    ks = jax.random.split(key, 4)
    std = 0.02
    ln1w = jnp.ones((1, n_embd), jnp.float32)
    ln1b = jnp.zeros((1, n_embd), jnp.float32)
    wqkv = jax.random.normal(ks[0], (n_embd, 3 * n_embd), jnp.float32) * std
    bqkv = jnp.zeros((1, 3 * n_embd), jnp.float32)
    wo = jax.random.normal(ks[1], (n_embd, n_embd), jnp.float32) * std
    bo = jnp.zeros((1, n_embd), jnp.float32)
    ln2w = jnp.ones((1, n_embd), jnp.float32)
    ln2b = jnp.zeros((1, n_embd), jnp.float32)
    wfc = jax.random.normal(ks[2], (n_embd, 4 * n_embd), jnp.float32) * std
    bfc = jnp.zeros((1, 4 * n_embd), jnp.float32)
    wp = jax.random.normal(ks[3], (4 * n_embd, n_embd), jnp.float32) * std
    bp = jnp.zeros((1, n_embd), jnp.float32)
    return (ln1w, ln1b, wqkv, bqkv, wo, bo, ln2w, ln2b, wfc, bfc, wp, bp)


if __name__ == "__main__":
    # Small but non-trivial: exercises both query-tile and kv-tile grid axes
    # (stage-2 grid = (2, 2, 2)) plus the causal tile-skip path.
    B, T, C, n_head = 2, 16, 64, 4
    key = jax.random.PRNGKey(0)
    kx, kp = jax.random.split(key)
    x = jax.random.normal(kx, (B, T, C), jnp.float32)
    params = init_params(kp, C)

    out = transformer_block(x, params, n_head, tq=8, tk=8)
    out = jax.block_until_ready(out)
    assert out.shape == (B, T, C)
    assert out.dtype == jnp.float32

    ref = reference_block(x, params, n_head)
    # bf16 MXU operands / bf16 K,V in HBM => relaxed tolerance vs f32 reference
    # (LayerNorm, softmax accumulation and GELU stay f32, so drift is small).
    np.testing.assert_allclose(np.asarray(out), np.asarray(ref), atol=2e-2, rtol=2e-2)

    print("KERNEL_OK")
</pallas_src>

<mosaic_0001>
module attributes {stable_mosaic.version = 11 : i64} {
  func.func @_copy(%arg0: i32, %arg1: memref<8x128xf32, #tpu.memory_space<vmem>>, %arg2: memref<8x128xf32, #tpu.memory_space<vmem>>) attributes {dimension_semantics = [#tpu.dimension_semantics<arbitrary>], iteration_bounds = array<i64: 1>, scalar_prefetch = 0 : i64, scratch_operands = 0 : i64, tpu.core_type = #tpu.core_type<tc>, window_params = [{pipeline_mode = #tpu.pipeline_mode<synchronous>, transform_indices = @transform_0, window_bounds = array<i64: 8, 128>}, {pipeline_mode = #tpu.pipeline_mode<synchronous>, transform_indices = @transform_1, window_bounds = array<i64: 8, 128>}]} {
    %c0 = arith.constant 0 : index
    %c0_0 = arith.constant 0 : index
    %0 = vector.load %arg1[%c0, %c0_0] : memref<8x128xf32, #tpu.memory_space<vmem>>, vector<8x128xf32>
    %c0_1 = arith.constant 0 : index
    %c0_2 = arith.constant 0 : index
    %1 = vector.load %arg2[%c0_1, %c0_2] : memref<8x128xf32, #tpu.memory_space<vmem>>, vector<8x128xf32>
    tpu.vector_store %arg2[%c0_1, %c0_2], %0 {strides = array<i32>} : memref<8x128xf32, #tpu.memory_space<vmem>>, vector<8x128xf32>,
    return
  }
  func.func @transform_0(%arg0: i32) -> (i32, i32) {
    %c0_i32 = arith.constant 0 : i32
    %c0_i32_0 = arith.constant 0 : i32
    %c0_i32_1 = arith.constant 0 : i32
    return %c0_i32, %c0_i32_0 : i32, i32
  }
  func.func @transform_1(%arg0: i32) -> (i32, i32) {
    %c0_i32 = arith.constant 0 : i32
    %c0_i32_0 = arith.constant 0 : i32
    %c0_i32_1 = arith.constant 0 : i32
    return %c0_i32, %c0_i32_0 : i32, i32
  }
}

module attributes {stable_mosaic.version = 11 : i64} {
  func.func @qkv_kernel(%arg0: i32, %arg1: i32, %arg2: memref<1x8x64xf32, #tpu.memory_space<vmem>>, %arg3: memref<1x64xf32, #tpu.memory_space<vmem>>, %arg4: memref<1x64xf32, #tpu.memory_space<vmem>>, %arg5: memref<64x64xbf16, #tpu.memory_space<vmem>>, %arg6: memref<1x64xf32, #tpu.memory_space<vmem>>, %arg7: memref<64x64xbf16, #tpu.memory_space<vmem>>, %arg8: memref<1x64xf32, #tpu.memory_space<vmem>>, %arg9: memref<64x64xbf16, #tpu.memory_space<vmem>>, %arg10: memref<1x64xf32, #tpu.memory_space<vmem>>, %arg11: memref<1x4x8x16xbf16, #tpu.memory_space<vmem>>, %arg12: memref<1x4x8x16xbf16, #tpu.memory_space<vmem>>, %arg13: memref<1x4x8x16xbf16, #tpu.memory_space<vmem>>) attributes {dimension_semantics = [#tpu.dimension_semantics<parallel>, #tpu.dimension_semantics<parallel>], iteration_bounds = array<i64: 2, 2>, scalar_prefetch = 0 : i64, scratch_operands = 0 : i64, tpu.core_type = #tpu.core_type<tc>, window_params = [{transform_indices = @transform_0, window_bounds = array<i64: 1, 8, 64>}, {pipeline_mode = #tpu.pipeline_mode<synchronous>, transform_indices = @transform_1, window_bounds = array<i64: 1, 64>}, {pipeline_mode = #tpu.pipeline_mode<synchronous>, transform_indices = @transform_2, window_bounds = array<i64: 1, 64>}, {pipeline_mode = #tpu.pipeline_mode<synchronous>, transform_indices = @transform_3, window_bounds = array<i64: 64, 64>}, {pipeline_mode = #tpu.pipeline_mode<synchronous>, transform_indices = @transform_4, window_bounds = array<i64: 1, 64>}, {pipeline_mode = #tpu.pipeline_mode<synchronous>, transform_indices = @transform_5, window_bounds = array<i64: 64, 64>}, {pipeline_mode = #tpu.pipeline_mode<synchronous>, transform_indices = @transform_6, window_bounds = array<i64: 1, 64>}, {pipeline_mode = #tpu.pipeline_mode<synchronous>, transform_indices = @transform_7, window_bounds = array<i64: 64, 64>}, {pipeline_mode = #tpu.pipeline_mode<synchronous>, transform_indices = @transform_8, window_bounds = array<i64: 1, 64>}, {transform_indices = @transform_9, window_bounds = array<i64: 1, 4, 8, 16>}, {transform_indices = @transform_10, window_bounds = array<i64: 1, 4, 8, 16>}, {transform_indices = @transform_11, window_bounds = array<i64: 1, 4, 8, 16>}]} {
    %c0 = arith.constant 0 : index
    %c0_0 = arith.constant 0 : index
    %c0_1 = arith.constant 0 : index
    %0 = vector.load %arg2[%c0, %c0_0, %c0_1] : memref<1x8x64xf32, #tpu.memory_space<vmem>>, vector<1x8x64xf32>
    %1 = vector.shape_cast %0 : vector<1x8x64xf32> to vector<8x64xf32>
    %c0_2 = arith.constant 0 : index
    %c0_3 = arith.constant 0 : index
    %2 = vector.load %arg3[%c0_2, %c0_3] : memref<1x64xf32, #tpu.memory_space<vmem>>, vector<1x64xf32>
    %c0_4 = arith.constant 0 : index
    %c0_5 = arith.constant 0 : index
    %3 = vector.load %arg4[%c0_4, %c0_5] : memref<1x64xf32, #tpu.memory_space<vmem>>, vector<1x64xf32>
    %cst = arith.constant dense<0.000000e+00> : vector<8xf32>
    %4 = vector.multi_reduction <add>, %1, %cst [1] : vector<8x64xf32> to vector<8xf32>
    %5 = vector.shape_cast %4 : vector<8xf32> to vector<8x1xf32>
    %cst_6 = arith.constant 6.400000e+01 : f32
    %6 = vector.broadcast %cst_6 : f32 to vector<8x1xf32>
    %7 = arith.divf %5, %6 : vector<8x1xf32>
    %8 = vector.broadcast %7 : vector<8x1xf32> to vector<8x64xf32>
    %9 = arith.subf %1, %8 : vector<8x64xf32>
    %10 = arith.mulf %9, %9 : vector<8x64xf32>
    %cst_7 = arith.constant dense<0.000000e+00> : vector<8xf32>
    %11 = vector.multi_reduction <add>, %10, %cst_7 [1] : vector<8x64xf32> to vector<8xf32>
    %12 = vector.shape_cast %11 : vector<8xf32> to vector<8x1xf32>
    %cst_8 = arith.constant 6.400000e+01 : f32
    %13 = vector.broadcast %cst_8 : f32 to vector<8x1xf32>
    %14 = arith.divf %12, %13 : vector<8x1xf32>
    %15 = vector.broadcast %7 : vector<8x1xf32> to vector<8x64xf32>
    %16 = arith.subf %1, %15 : vector<8x64xf32>
    %cst_9 = arith.constant 9.99999974E-6 : f32
    %17 = vector.broadcast %cst_9 : f32 to vector<8x1xf32>
    %18 = arith.addf %14, %17 : vector<8x1xf32>
    %19 = math.rsqrt %18 : vector<8x1xf32>
    %20 = vector.broadcast %19 : vector<8x1xf32> to vector<8x64xf32>
    %21 = arith.mulf %16, %20 : vector<8x64xf32>
    %22 = vector.broadcast %2 : vector<1x64xf32> to vector<8x64xf32>
    %23 = arith.mulf %21, %22 : vector<8x64xf32>
    %24 = vector.broadcast %3 : vector<1x64xf32> to vector<8x64xf32>
    %25 = arith.addf %23, %24 : vector<8x64xf32>
    %26 = arith.truncf %25 : vector<8x64xf32> to vector<8x64xbf16>
    %c0_10 = arith.constant 0 : index
    %c0_11 = arith.constant 0 : index
    %27 = vector.load %arg5[%c0_10, %c0_11] : memref<64x64xbf16, #tpu.memory_space<vmem>>, vector<64x64xbf16>
    %cst_12 = arith.constant dense<0.000000e+00> : vector<8x64xf32>
    %28 = tpu.matmul %26, %27, %cst_12 {dimension_numbers = #tpu.dot_dimension_numbers<[1], [0], [0], [1], [0, 0, 1, 1], [], []>} : vector<8x64xbf16>, vector<64x64xbf16>, vector<8x64xf32> -> vector<8x64xf32>
    %c0_13 = arith.constant 0 : index
    %c0_14 = arith.constant 0 : index
    %29 = vector.load %arg6[%c0_13, %c0_14] : memref<1x64xf32, #tpu.memory_space<vmem>>, vector<1x64xf32>
    %30 = vector.broadcast %29 : vector<1x64xf32> to vector<8x64xf32>
    %31 = arith.addf %28, %30 : vector<8x64xf32>
    %32 = vector.extract_strided_slice %31 {offsets = [0, 0], sizes = [8, 16], strides = [1, 1]} : vector<8x64xf32> to vector<8x16xf32>
    %33 = arith.truncf %32 : vector<8x16xf32> to vector<8x16xbf16>
    %c0_15 = arith.constant 0 : index
    %c0_16 = arith.constant 0 : index
    %c0_17 = arith.constant 0 : index
    %c0_18 = arith.constant 0 : index
    %34 = vector.load %arg11[%c0_15, %c0_16, %c0_17, %c0_18] : memref<1x4x8x16xbf16, #tpu.memory_space<vmem>>, vector<1x1x8x16xbf16>
    %35 = vector.shape_cast %34 : vector<1x1x8x16xbf16> to vector<8x16xbf16>
    %36 = vector.shape_cast %33 : vector<8x16xbf16> to vector<1x1x8x16xbf16>
    tpu.vector_store %arg11[%c0_15, %c0_16, %c0_17, %c0_18], %36 {strides = array<i32>} : memref<1x4x8x16xbf16, #tpu.memory_space<vmem>>, vector<1x1x8x16xbf16>,
    %37 = vector.extract_strided_slice %31 {offsets = [0, 16], sizes = [8, 16], strides = [1, 1]} : vector<8x64xf32> to vector<8x16xf32>
    %38 = arith.truncf %37 : vector<8x16xf32> to vector<8x16xbf16>
    %c0_19 = arith.constant 0 : index
    %c1 = arith.constant 1 : index
    %c0_20 = arith.constant 0 : index
    %c0_21 = arith.constant 0 : index
    %39 = vector.load %arg11[%c0_19, %c1, %c0_20, %c0_21] : memref<1x4x8x16xbf16, #tpu.memory_space<vmem>>, vector<1x1x8x16xbf16>
    %40 = vector.shape_cast %39 : vector<1x1x8x16xbf16> to vector<8x16xbf16>
    %41 = vector.shape_cast %38 : vector<8x16xbf16> to vector<1x1x8x16xbf16>
    tpu.vector_store %arg11[%c0_19, %c1, %c0_20, %c0_21], %41 {strides = array<i32>} : memref<1x4x8x16xbf16, #tpu.memory_space<vmem>>, vector<1x1x8x16xbf16>,
    %42 = vector.extract_strided_slice %31 {offsets = [0, 32], sizes = [8, 16], strides = [1, 1]} : vector<8x64xf32> to vector<8x16xf32>
    %43 = arith.truncf %42 : vector<8x16xf32> to vector<8x16xbf16>
    %c0_22 = arith.constant 0 : index
    %c2 = arith.constant 2 : index
    %c0_23 = arith.constant 0 : index
    %c0_24 = arith.constant 0 : index
    %44 = vector.load %arg11[%c0_22, %c2, %c0_23, %c0_24] : memref<1x4x8x16xbf16, #tpu.memory_space<vmem>>, vector<1x1x8x16xbf16>
    %45 = vector.shape_cast %44 : vector<1x1x8x16xbf16> to vector<8x16xbf16>
    %46 = vector.shape_cast %43 : vector<8x16xbf16> to vector<1x1x8x16xbf16>
    tpu.vector_store %arg11[%c0_22, %c2, %c0_23, %c0_24], %46 {strides = array<i32>} : memref<1x4x8x16xbf16, #tpu.memory_space<vmem>>, vector<1x1x8x16xbf16>,
    %47 = vector.extract_strided_slice %31 {offsets = [0, 48], sizes = [8, 16], strides = [1, 1]} : vector<8x64xf32> to vector<8x16xf32>
    %48 = arith.truncf %47 : vector<8x16xf32> to vector<8x16xbf16>
    %c0_25 = arith.constant 0 : index
    %c3 = arith.constant 3 : index
    %c0_26 = arith.constant 0 : index
    %c0_27 = arith.constant 0 : index
    %49 = vector.load %arg11[%c0_25, %c3, %c0_26, %c0_27] : memref<1x4x8x16xbf16, #tpu.memory_space<vmem>>, vector<1x1x8x16xbf16>
    %50 = vector.shape_cast %49 : vector<1x1x8x16xbf16> to vector<8x16xbf16>
    %51 = vector.shape_cast %48 : vector<8x16xbf16> to vector<1x1x8x16xbf16>
    tpu.vector_store %arg11[%c0_25, %c3, %c0_26, %c0_27], %51 {strides = array<i32>} : memref<1x4x8x16xbf16, #tpu.memory_space<vmem>>, vector<1x1x8x16xbf16>,
    %c0_28 = arith.constant 0 : index
    %c0_29 = arith.constant 0 : index
    %52 = vector.load %arg7[%c0_28, %c0_29] : memref<64x64xbf16, #tpu.memory_space<vmem>>, vector<64x64xbf16>
    %cst_30 = arith.constant dense<0.000000e+00> : vector<8x64xf32>
    %53 = tpu.matmul %26, %52, %cst_30 {dimension_numbers = #tpu.dot_dimension_numbers<[1], [0], [0], [1], [0, 0, 1, 1], [], []>} : vector<8x64xbf16>, vector<64x64xbf16>, vector<8x64xf32> -> vector<8x64xf32>
    %c0_31 = arith.constant 0 : index
    %c0_32 = arith.constant 0 : index
    %54 = vector.load %arg8[%c0_31, %c0_32] : memref<1x64xf32, #tpu.memory_space<vmem>>, vector<1x64xf32>
    %55 = vector.broadcast %54 : vector<1x64xf32> to vector<8x64xf32>
    %56 = arith.addf %53, %55 : vector<8x64xf32>
    %57 = vector.extract_strided_slice %56 {offsets = [0, 0], sizes = [8, 16], strides = [1, 1]} : vector<8x64xf32> to vector<8x16xf32>
    %58 = arith.truncf %57 : vector<8x16xf32> to vector<8x16xbf16>
    %c0_33 = arith.constant 0 : index
    %c0_34 = arith.constant 0 : index
    %c0_35 = arith.constant 0 : index
    %c0_36 = arith.constant 0 : index
    %59 = vector.load %arg12[%c0_33, %c0_34, %c0_35, %c0_36] : memref<1x4x8x16xbf16, #tpu.memory_space<vmem>>, vector<1x1x8x16xbf16>
    %60 = vector.shape_cast %59 : vector<1x1x8x16xbf16> to vector<8x16xbf16>
    %61 = vector.shape_cast %58 : vector<8x16xbf16> to vector<1x1x8x16xbf16>
    tpu.vector_store %arg12[%c0_33, %c0_34, %c0_35, %c0_36], %61 {strides = array<i32>} : memref<1x4x8x16xbf16, #tpu.memory_space<vmem>>, vector<1x1x8x16xbf16>,
    %62 = vector.extract_strided_slice %56 {offsets = [0, 16], sizes = [8, 16], strides = [1, 1]} : vector<8x64xf32> to vector<8x16xf32>
    %63 = arith.truncf %62 : vector<8x16xf32> to vector<8x16xbf16>
    %c0_37 = arith.constant 0 : index
    %c1_38 = arith.constant 1 : index
    %c0_39 = arith.constant 0 : index
    %c0_40 = arith.constant 0 : index
    %64 = vector.load %arg12[%c0_37, %c1_38, %c0_39, %c0_40] : memref<1x4x8x16xbf16, #tpu.memory_space<vmem>>, vector<1x1x8x16xbf16>
    %65 = vector.shape_cast %64 : vector<1x1x8x16xbf16> to vector<8x16xbf16>
    %66 = vector.shape_cast %63 : vector<8x16xbf16> to vector<1x1x8x16xbf16>
    tpu.vector_store %arg12[%c0_37, %c1_38, %c0_39, %c0_40], %66 {strides = array<i32>} : memref<1x4x8x16xbf16, #tpu.memory_space<vmem>>, vector<1x1x8x16xbf16>,
    %67 = vector.extract_strided_slice %56 {offsets = [0, 32], sizes = [8, 16], strides = [1, 1]} : vector<8x64xf32> to vector<8x16xf32>
    %68 = arith.truncf %67 : vector<8x16xf32> to vector<8x16xbf16>
    %c0_41 = arith.constant 0 : index
    %c2_42 = arith.constant 2 : index
    %c0_43 = arith.constant 0 : index
    %c0_44 = arith.constant 0 : index
    %69 = vector.load %arg12[%c0_41, %c2_42, %c0_43, %c0_44] : memref<1x4x8x16xbf16, #tpu.memory_space<vmem>>, vector<1x1x8x16xbf16>
    %70 = vector.shape_cast %69 : vector<1x1x8x16xbf16> to vector<8x16xbf16>
    %71 = vector.shape_cast %68 : vector<8x16xbf16> to vector<1x1x8x16xbf16>
    tpu.vector_store %arg12[%c0_41, %c2_42, %c0_43, %c0_44], %71 {strides = array<i32>} : memref<1x4x8x16xbf16, #tpu.memory_space<vmem>>, vector<1x1x8x16xbf16>,
    %72 = vector.extract_strided_slice %56 {offsets = [0, 48], sizes = [8, 16], strides = [1, 1]} : vector<8x64xf32> to vector<8x16xf32>
    %73 = arith.truncf %72 : vector<8x16xf32> to vector<8x16xbf16>
    %c0_45 = arith.constant 0 : index
    %c3_46 = arith.constant 3 : index
    %c0_47 = arith.constant 0 : index
    %c0_48 = arith.constant 0 : index
    %74 = vector.load %arg12[%c0_45, %c3_46, %c0_47, %c0_48] : memref<1x4x8x16xbf16, #tpu.memory_space<vmem>>, vector<1x1x8x16xbf16>
    %75 = vector.shape_cast %74 : vector<1x1x8x16xbf16> to vector<8x16xbf16>
    %76 = vector.shape_cast %73 : vector<8x16xbf16> to vector<1x1x8x16xbf16>
    tpu.vector_store %arg12[%c0_45, %c3_46, %c0_47, %c0_48], %76 {strides = array<i32>} : memref<1x4x8x16xbf16, #tpu.memory_space<vmem>>, vector<1x1x8x16xbf16>,
    %c0_49 = arith.constant 0 : index
    %c0_50 = arith.constant 0 : index
    %77 = vector.load %arg9[%c0_49, %c0_50] : memref<64x64xbf16, #tpu.memory_space<vmem>>, vector<64x64xbf16>
    %cst_51 = arith.constant dense<0.000000e+00> : vector<8x64xf32>
    %78 = tpu.matmul %26, %77, %cst_51 {dimension_numbers = #tpu.dot_dimension_numbers<[1], [0], [0], [1], [0, 0, 1, 1], [], []>} : vector<8x64xbf16>, vector<64x64xbf16>, vector<8x64xf32> -> vector<8x64xf32>
    %c0_52 = arith.constant 0 : index
    %c0_53 = arith.constant 0 : index
    %79 = vector.load %arg10[%c0_52, %c0_53] : memref<1x64xf32, #tpu.memory_space<vmem>>, vector<1x64xf32>
    %80 = vector.broadcast %79 : vector<1x64xf32> to vector<8x64xf32>
    %81 = arith.addf %78, %80 : vector<8x64xf32>
    %82 = vector.extract_strided_slice %81 {offsets = [0, 0], sizes = [8, 16], strides = [1, 1]} : vector<8x64xf32> to vector<8x16xf32>
    %83 = arith.truncf %82 : vector<8x16xf32> to vector<8x16xbf16>
    %c0_54 = arith.constant 0 : index
    %c0_55 = arith.constant 0 : index
    %c0_56 = arith.constant 0 : index
    %c0_57 = arith.constant 0 : index
    %84 = vector.load %arg13[%c0_54, %c0_55, %c0_56, %c0_57] : memref<1x4x8x16xbf16, #tpu.memory_space<vmem>>, vector<1x1x8x16xbf16>
    %85 = vector.shape_cast %84 : vector<1x1x8x16xbf16> to vector<8x16xbf16>
    %86 = vector.shape_cast %83 : vector<8x16xbf16> to vector<1x1x8x16xbf16>
    tpu.vector_store %arg13[%c0_54, %c0_55, %c0_56, %c0_57], %86 {strides = array<i32>} : memref<1x4x8x16xbf16, #tpu.memory_space<vmem>>, vector<1x1x8x16xbf16>,
    %87 = vector.extract_strided_slice %81 {offsets = [0, 16], sizes = [8, 16], strides = [1, 1]} : vector<8x64xf32> to vector<8x16xf32>
    %88 = arith.truncf %87 : vector<8x16xf32> to vector<8x16xbf16>
    %c0_58 = arith.constant 0 : index
    %c1_59 = arith.constant 1 : index
    %c0_60 = arith.constant 0 : index
    %c0_61 = arith.constant 0 : index
    %89 = vector.load %arg13[%c0_58, %c1_59, %c0_60, %c0_61] : memref<1x4x8x16xbf16, #tpu.memory_space<vmem>>, vector<1x1x8x16xbf16>
    %90 = vector.shape_cast %89 : vector<1x1x8x16xbf16> to vector<8x16xbf16>
    %91 = vector.shape_cast %88 : vector<8x16xbf16> to vector<1x1x8x16xbf16>
    tpu.vector_store %arg13[%c0_58, %c1_59, %c0_60, %c0_61], %91 {strides = array<i32>} : memref<1x4x8x16xbf16, #tpu.memory_space<vmem>>, vector<1x1x8x16xbf16>,
    %92 = vector.extract_strided_slice %81 {offsets = [0, 32], sizes = [8, 16], strides = [1, 1]} : vector<8x64xf32> to vector<8x16xf32>
    %93 = arith.truncf %92 : vector<8x16xf32> to vector<8x16xbf16>
    %c0_62 = arith.constant 0 : index
    %c2_63 = arith.constant 2 : index
    %c0_64 = arith.constant 0 : index
    %c0_65 = arith.constant 0 : index
    %94 = vector.load %arg13[%c0_62, %c2_63, %c0_64, %c0_65] : memref<1x4x8x16xbf16, #tpu.memory_space<vmem>>, vector<1x1x8x16xbf16>
    %95 = vector.shape_cast %94 : vector<1x1x8x16xbf16> to vector<8x16xbf16>
    %96 = vector.shape_cast %93 : vector<8x16xbf16> to vector<1x1x8x16xbf16>
    tpu.vector_store %arg13[%c0_62, %c2_63, %c0_64, %c0_65], %96 {strides = array<i32>} : memref<1x4x8x16xbf16, #tpu.memory_space<vmem>>, vector<1x1x8x16xbf16>,
    %97 = vector.extract_strided_slice %81 {offsets = [0, 48], sizes = [8, 16], strides = [1, 1]} : vector<8x64xf32> to vector<8x16xf32>
    %98 = arith.truncf %97 : vector<8x16xf32> to vector<8x16xbf16>
    %c0_66 = arith.constant 0 : index
    %c3_67 = arith.constant 3 : index
    %c0_68 = arith.constant 0 : index
    %c0_69 = arith.constant 0 : index
    %99 = vector.load %arg13[%c0_66, %c3_67, %c0_68, %c0_69] : memref<1x4x8x16xbf16, #tpu.memory_space<vmem>>, vector<1x1x8x16xbf16>
    %100 = vector.shape_cast %99 : vector<1x1x8x16xbf16> to vector<8x16xbf16>
    %101 = vector.shape_cast %98 : vector<8x16xbf16> to vector<1x1x8x16xbf16>
    tpu.vector_store %arg13[%c0_66, %c3_67, %c0_68, %c0_69], %101 {strides = array<i32>} : memref<1x4x8x16xbf16, #tpu.memory_space<vmem>>, vector<1x1x8x16xbf16>,
    return
  }
  func.func @transform_0(%arg0: i32, %arg1: i32) -> (i32, i32, i32) {
    %c0_i32 = arith.constant 0 : i32
    %c0_i32_0 = arith.constant 0 : i32
    return %arg0, %arg1, %c0_i32 : i32, i32, i32
  }
  func.func @transform_1(%arg0: i32, %arg1: i32) -> (i32, i32) {
    %c0_i32 = arith.constant 0 : i32
    %c0_i32_0 = arith.constant 0 : i32
    %c0_i32_1 = arith.constant 0 : i32
    return %c0_i32, %c0_i32_0 : i32, i32
  }
  func.func @transform_2(%arg0: i32, %arg1: i32) -> (i32, i32) {
    %c0_i32 = arith.constant 0 : i32
    %c0_i32_0 = arith.constant 0 : i32
    %c0_i32_1 = arith.constant 0 : i32
    return %c0_i32, %c0_i32_0 : i32, i32
  }
  func.func @transform_3(%arg0: i32, %arg1: i32) -> (i32, i32) {
    %c0_i32 = arith.constant 0 : i32
    %c0_i32_0 = arith.constant 0 : i32
    %c0_i32_1 = arith.constant 0 : i32
    return %c0_i32, %c0_i32_0 : i32, i32
  }
  func.func @transform_4(%arg0: i32, %arg1: i32) -> (i32, i32) {
    %c0_i32 = arith.constant 0 : i32
    %c0_i32_0 = arith.constant 0 : i32
    %c0_i32_1 = arith.constant 0 : i32
    return %c0_i32, %c0_i32_0 : i32, i32
  }
  func.func @transform_5(%arg0: i32, %arg1: i32) -> (i32, i32) {
    %c0_i32 = arith.constant 0 : i32
    %c0_i32_0 = arith.constant 0 : i32
    %c0_i32_1 = arith.constant 0 : i32
    return %c0_i32, %c0_i32_0 : i32, i32
  }
  func.func @transform_6(%arg0: i32, %arg1: i32) -> (i32, i32) {
    %c0_i32 = arith.constant 0 : i32
    %c0_i32_0 = arith.constant 0 : i32
    %c0_i32_1 = arith.constant 0 : i32
    return %c0_i32, %c0_i32_0 : i32, i32
  }
  func.func @transform_7(%arg0: i32, %arg1: i32) -> (i32, i32) {
    %c0_i32 = arith.constant 0 : i32
    %c0_i32_0 = arith.constant 0 : i32
    %c0_i32_1 = arith.constant 0 : i32
    return %c0_i32, %c0_i32_0 : i32, i32
  }
  func.func @transform_8(%arg0: i32, %arg1: i32) -> (i32, i32) {
    %c0_i32 = arith.constant 0 : i32
    %c0_i32_0 = arith.constant 0 : i32
    %c0_i32_1 = arith.constant 0 : i32
    return %c0_i32, %c0_i32_0 : i32, i32
  }
  func.func @transform_9(%arg0: i32, %arg1: i32) -> (i32, i32, i32, i32) {
    %c0_i32 = arith.constant 0 : i32
    %c0_i32_0 = arith.constant 0 : i32
    %c0_i32_1 = arith.constant 0 : i32
    return %arg0, %c0_i32, %arg1, %c0_i32_0 : i32, i32, i32, i32
  }
  func.func @transform_10(%arg0: i32, %arg1: i32) -> (i32, i32, i32, i32) {
    %c0_i32 = arith.constant 0 : i32
    %c0_i32_0 = arith.constant 0 : i32
    %c0_i32_1 = arith.constant 0 : i32
    return %arg0, %c0_i32, %arg1, %c0_i32_0 : i32, i32, i32, i32
  }
  func.func @transform_11(%arg0: i32, %arg1: i32) -> (i32, i32, i32, i32) {
    %c0_i32 = arith.constant 0 : i32
    %c0_i32_0 = arith.constant 0 : i32
    %c0_i32_1 = arith.constant 0 : i32
    return %arg0, %c0_i32, %arg1, %c0_i32_0 : i32, i32, i32, i32
  }
}

</mosaic_0001>

<bundles_post_ra>
// kernel: tpu_custom_call.1
= control target key start
LH: loop header
LB: loop body
LE: loop exit
PB: predicated region body
PF: predicated region fallthrough
CT: control target
= control target key end

     0   :  { %6 = vsyncpa [#allocation3], 0  ;;  %s124_s0 = inlined_call_operand.hbm [shape: f32[8,128], index: 0, kind: input, shape index: {}]   ;;  %s125_s1 = inlined_call_operand.hbm [shape: f32[8,128], index: 1, kind: output, shape index: {}]  }
   0x1   :  { %7 = vsyncpa [#allocation4], 0  ;;  %s88_s6 = smov [#allocation2]   ;;  %s40_s10 = scalar_lea.hbm %s124_s0, 128 }
   0x2   :  { %s14_s7 = sshll.u32 %s88_s6, 4  ;;  %p41_p0 = scmp.ne.s32.totalorder %s124_s0, %s40_s10  ;;  %s15_s7 = int_to_ptr.vmem [resolvable:$true] %s14_s7 }
   0x3   :  { %p44_p1 = scmp.lt.u32.totalorder %s40_s10, %s124_s0 }
   0x5   :  { %p46_p2 = pnand %p44_p1, %p41_p0 }
   0x7   :  { %49 = shalt.err (!%p46_p2)
}
   0x8   :  { %s50_s15 = scalar_lea.vmem %s15_s7, 128  ;;  %p55_p4 = scmp.lt.s32.totalorder %s15_s7, %s15_s7 }
   0x9   :  { %p51_p3 = scmp.ne.s32.totalorder %s15_s7, %s50_s15  ;;  %p56_p5 = scmp.lt.s32.totalorder %s50_s15, %s50_s15 }
   0xb   :  { %p57_p6 = por %p56_p5, %p55_p4 }
   0xd   :  { %p58_p7 = pnand %p57_p6, %p51_p3 }
   0xf   :  { %61 = shalt.err (!%p58_p7)
}
  0x10   :  { %17 = dma.hbm_to_vmem [thread:$0]  %s124_s0, 128, %s15_s7, [#allocation3]  }
  0x11   :  { %84 = dma.done.wait [#allocation3], 128  }
  0x12   :  { %85 = vsyncadd [#allocation3], 4294967168  ;;  %s89_s18 = smov [#allocation5]   ;;  %v21_v0 = vld [vmem:[#allocation2] sm:$0xff] }
  0x13   :  { %s29_s19 = sshll.u32 %s89_s18, 4  ;;  %22 = vst [vmem:[#allocation5] sm:$0xff] %v21_v0  ;;  %s30_s19 = int_to_ptr.vmem [resolvable:$true] %s29_s19 }
  0x14   :  { %s62_s20 = scalar_lea.vmem %s30_s19, 128  ;;  %p67_p9 = scmp.lt.s32.totalorder %s30_s19, %s30_s19 }
  0x15   :  { %p63_p8 = scmp.ne.s32.totalorder %s30_s19, %s62_s20  ;;  %p68_p10 = scmp.lt.s32.totalorder %s62_s20, %s62_s20 }
  0x17   :  { %p69_p11 = por %p68_p10, %p67_p9 }
  0x19   :  { %p70_p12 = pnand %p69_p11, %p63_p8 }
  0x1b   :  { %73 = shalt.err (!%p70_p12)
}
  0x1c   :  { %s74_s23 = scalar_lea.hbm %s125_s1, 128 }
  0x1d   :  { %p75_p13 = scmp.ne.s32.totalorder %s125_s1, %s74_s23  ;;  %p78_p0 = scmp.lt.u32.totalorder %s74_s23, %s125_s1 }
  0x1f   :  { %p80_p1 = pnand %p78_p0, %p75_p13 }
  0x21   :  { %83 = shalt.err (!%p80_p1)
}
  0x22   :  { %32 = dma.vmem_to_hbm [thread:$0]  %s30_s19, 128, %s125_s1, [#allocation4]  }
  0x23   :  { %86 = dma.done.wait [#allocation4], 128  }
  0x24   :  { %87 = vsyncadd [#allocation4], 4294967168 }
  0x25   :  { %36 = vsyncpa [#allocation3], 1 }
  0x26   :  { %37 = vsyncpa [#allocation4], 1 }

// kernel: tpu_custom_call.1
= control target key start
LH: loop header
LB: loop body
LE: loop exit
PB: predicated region body
PF: predicated region fallthrough
CT: control target
= control target key end

     0   :  { %s2130_s0 = inlined_call_operand.hbm [shape: f32[2,16,64], index: 0, kind: input, shape index: {}]   ;;  %s2131_s1 = inlined_call_operand.vmem [shape: f32[1,64], index: 1, kind: input, shape index: {}]   ;;  %s2132_s2 = inlined_call_operand.vmem [shape: f32[1,64], index: 2, kind: input, shape index: {}]   ;;  %s2133_s3 = inlined_call_operand.hbm [shape: bf16[64,64], index: 3, kind: input, shape index: {}]   ;;  %s2134_s4 = inlined_call_operand.vmem [shape: f32[1,64], index: 4, kind: input, shape index: {}]   ;;  %s2135_s5 = inlined_call_operand.hbm [shape: bf16[64,64], index: 5, kind: input, shape index: {}]   ;;  %s2136_s6 = inlined_call_operand.vmem [shape: f32[1,64], index: 6, kind: input, shape index: {}]   ;;  %s2137_s7 = inlined_call_operand.hbm [shape: bf16[64,64], index: 7, kind: input, shape index: {}]   ;;  %s2138_s8 = inlined_call_operand.vmem [shape: f32[1,64], index: 8, kind: input, shape index: {}]   ;;  %s2139_s9 = inlined_call_operand.hbm [shape: bf16[2,4,16,16], index: 9, kind: output, shape index: {0}]   ;;  %s2140_s10 = inlined_call_operand.hbm [shape: bf16[2,4,16,16], index: 10, kind: output, shape index: {1}]   ;;  %s2141_s11 = inlined_call_operand.hbm [shape: bf16[2,4,16,16], index: 11, kind: output, shape index: {2}]  }
   0x1   :  { %2153 = sst [smem:[#allocation23_spill]] %s2133_s3 }
   0x2   :  { %2154 = sst [smem:[#allocation24_spill]] %s2135_s5 }
   0x3   :  { %2155 = sst [smem:[#allocation25_spill]] %s2136_s6 }
   0x4   :  { %2156 = sst [smem:[#allocation26_spill]] %s2137_s7 }
   0x5   :  { %2157 = sst [smem:[#allocation27_spill]] %s2138_s8 }
   0x6   :  { %2158 = sst [smem:[#allocation28_spill]] %s2139_s9 }
   0x7   :  { %2159 = sst [smem:[#allocation29_spill]] %s2140_s10 }
   0x8   :  { %2160 = sst [smem:[#allocation30_spill]] %s2141_s11 }
   0x9   :  { %17 = vsyncpa [#allocation3], 0 }
   0xa   :  { %19 = vsyncpa [#allocation3 + $0x1], 0 }
   0xb   :  { %20 = vsyncpa [#allocation6], 0 }
   0xc   :  { %21 = vsyncpa [#allocation9], 0 }
   0xd   :  { %22 = vsyncpa [#allocation4], 0 }
   0xe   :  { %24 = vsyncpa [#allocation4 + $0x1], 0 }
   0xf   :  { %25 = vsyncpa [#allocation12], 0 }
  0x10   :  { %27 = vsyncpa [#allocation12 + $0x1], 0  ;;  %s1679_s17 = smov 0   ;;  %s1681_s18 = smov 0  }
  0x11   :  { %s1683_s19 = smov 0   ;;  %s1685_s20 = smov 0  }
  0x12   :  { %s1687_s21 = smov 0   ;;  %s1689_s22 = smov 0  }
  0x13   :  { %s1691_s23 = smov 0   ;;  %s1693_s24 = smov 0  }
  0x14 LB: > { %2161 = sst [smem:[#allocation19_spill]] %s1572_s17  ;;  %s1720_s25 = sadd.s32 4294967295, %s1600_s24   ;;  %s1600_s24 = sphi %s1693_s24, %s33_s24   ;;  %s1596_s23 = sphi %s1691_s23, %s2203_s23   ;;  %s1592_s22 = sphi %s1689_s22, %s2202_s22   ;;  %s1588_s21 = sphi %s1687_s21, %s2201_s21   ;;  %s1584_s20 = sphi %s1685_s20, %s2200_s20   ;;  %s1580_s19 = sphi %s1683_s19, %s2199_s19   ;;  %s1576_s18 = sphi %s1681_s18, %s2198_s18   ;;  %s1572_s17 = sphi %s1679_s17, %s2197_s17  }
  0x15   : > { %2162 = sst [smem:[#allocation20_spill]] %s1584_s20  ;;  %s2142_s26 = sadd.s32 4294967294, %s1600_s24  }
  0x16   : > { %2163 = sst [smem:[#allocation21_spill]] %s1588_s21  ;;  %p67_p0 = scmp.ne.s32.totalorder %s1576_s18, %s1572_s17 }
  0x17   : > { %p2148_p1 = scmp.eq.s32.totalorder %s1720_s25, 0  ;;  %p267_p3 = scmp.eq.s32.totalorder %s2142_s26, 3 }
  0x18   : > { %p1064_p5 = scmp.ge.s32.totalorder %s1600_s24, 1  ;;  %p330_p7 = scmp.lt.s32.totalorder %s1600_s24, 5 }
  0x19   : > { %p1731_p4 = por %p2148_p1, %p67_p0  ;;  %p1736_p6 = por %p267_p3, %p67_p0 }
  0x1a   : > { %p1741_p8 = pnand %p1064_p5, %p330_p7  ;;  %s1602_s30 = smov [#allocation5]  }
  0x1b   : > { %s2164_s27 = scalar_select %p1731_p4, 1, 0 }
  0x1c   : > { %s2165_s28 = scalar_select %p1736_p6, 1, 0 }
  0x1d   : > { %s2167_s29 = scalar_select %p1741_p8, 1, 0 }
  0x1e   : > { %2166 = sst [smem:[#allocation22_spill]] %s2165_s28  ;;  %s348_s12 = sshll.u32 %s1602_s30, 4  ;;  %s1745_s12 = int_to_ptr.vmem [resolvable:$true] %s348_s12 }
  0x1f   : > { %p1197_p9 = pneg %p1741_p8  ;;  %s1603_s14 = smov [#allocation7]  }
  0x20   : > { %s364_s15 = sshll.u32 %s1603_s14, 4  ;;  %s1604_s16 = smov [#allocation8]   ;;  %s1755_s15 = int_to_ptr.vmem [resolvable:$true] %s364_s15 }
  0x21   : > { %p1751_p10 = pnand %p1197_p9, %p2148_p1  ;;  %s1757_s26 = sshll.u32 %s1604_s16, 4  ;;  %s381_s26 = int_to_ptr.vmem [resolvable:$true] %s1757_s26 }
  0x22   : > { %s2169_s3 = sld [smem:[#allocation23_spill]] }
  0x23   : > { %p1767_p12 = pneg %p1751_p10 }
  0x28   : > { %s1320_s30 = scalar_lea.hbm %s2169_s3, 512 }
  0x29   : > { %p1321_p11 = scmp.ne.s32.totalorder %s2169_s3, %s1320_s30  ;;  %p1327_p3 = scmp.lt.u32.totalorder %s1320_s30, %s2169_s3 }
  0x2b   : > { %p1323_p13 = pnand %p1767_p12, %p1321_p11 }
  0x2d   : > { %p1324_p0 = pneg %p1323_p13 }
  0x2f   : > { %p1329_p5 = pnand %p1327_p3, %p1324_p0 }
  0x31   : > { %1332 = shalt.err (!%p1329_p5)
}
  0x32   : > { %s1333_s9 = scalar_lea.vmem %s1745_s12, 512  ;;  %p1341_p2 = scmp.lt.s32.totalorder %s1745_s12, %s1745_s12 }
  0x33   : > { %p1334_p7 = scmp.ne.s32.totalorder %s1745_s12, %s1333_s9  ;;  %p1342_p6 = scmp.lt.s32.totalorder %s1333_s9, %s1333_s9 }
  0x35   : > { %p1336_p9 = pnand %p1334_p7, %p1767_p12  ;;  %p1343_p11 = por %p1342_p6, %p1341_p2 }
  0x37   : > { %p1337_p1 = pneg %p1336_p9 }
  0x39   : > { %p1344_p13 = pnand %p1343_p11, %p1337_p1 }
  0x3b   : > { %1347 = shalt.err (!%p1344_p13)
}
  0x3c   : > { %s1605_s11 = smov 64   ;;  %s1606_s17 = smov 4  }
  0x3d   : > { %1200 = dma.hbm_to_vmem [thread:$0]  (!%p1751_p10), %s2169_s3, 512, %s1745_s12, [#allocation6], %s1605_s11, %s1605_s11, %s1606_s17  }
  0x3e   : > { %s2171_s5 = sld [smem:[#allocation24_spill]] }
  0x44   : > { %s1348_s9 = scalar_lea.hbm %s2171_s5, 512 }
  0x45   : > { %p1349_p1 = scmp.ne.s32.totalorder %s2171_s5, %s1348_s9  ;;  %p1355_p0 = scmp.lt.u32.totalorder %s1348_s9, %s2171_s5 }
  0x47   : > { %p1351_p2 = pnand %p1349_p1, %p1767_p12 }
  0x49   : > { %p1352_p6 = pneg %p1351_p2 }
  0x4b   : > { %p1357_p3 = pnand %p1355_p0, %p1352_p6 }
  0x4d   : > { %1360 = shalt.err (!%p1357_p3)
}
  0x4e   : > { %s1361_s12 = scalar_lea.vmem %s1755_s15, 512  ;;  %p1369_p11 = scmp.lt.s32.totalorder %s1755_s15, %s1755_s15 }
  0x4f   : > { %p1362_p5 = scmp.ne.s32.totalorder %s1755_s15, %s1361_s12  ;;  %p1370_p13 = scmp.lt.s32.totalorder %s1361_s12, %s1361_s12 }
  0x51   : > { %p1364_p7 = pnand %p1362_p5, %p1767_p12  ;;  %p1371_p1 = por %p1370_p13, %p1369_p11 }
  0x53   : > { %p1365_p9 = pneg %p1364_p7 }
  0x55   : > { %p1372_p2 = pnand %p1371_p1, %p1365_p9 }
  0x57   : > { %1375 = shalt.err (!%p1372_p2)
}
  0x58   : > { %1203 = dma.hbm_to_vmem [thread:$0]  (!%p1751_p10), %s2171_s5, 512, %s1755_s15, [#allocation6], %s1605_s11, %s1605_s11, %s1606_s17  }
  0x59   : > { %s2172_s7 = sld [smem:[#allocation26_spill]] }
  0x5f   : > { %s1376_s28 = scalar_lea.hbm %s2172_s7, 512 }
  0x60   : > { %p1377_p6 = scmp.ne.s32.totalorder %s2172_s7, %s1376_s28  ;;  %p1383_p5 = scmp.lt.u32.totalorder %s1376_s28, %s2172_s7 }
  0x62   : > { %p1379_p0 = pnand %p1377_p6, %p1767_p12 }
  0x64   : > { %p1380_p3 = pneg %p1379_p0 }
  0x66   : > { %p1385_p7 = pnand %p1383_p5, %p1380_p3 }
  0x68   : > { %1388 = shalt.err (!%p1385_p7)
}
  0x69   : > { %s1389_s12 = scalar_lea.vmem %s381_s26, 512  ;;  %p1397_p1 = scmp.lt.s32.totalorder %s381_s26, %s381_s26 }
  0x6a   : > { %p1390_p9 = scmp.ne.s32.totalorder %s381_s26, %s1389_s12  ;;  %p1398_p2 = scmp.lt.s32.totalorder %s1389_s12, %s1389_s12 }
  0x6c   : > { %p1392_p11 = pnand %p1390_p9, %p1767_p12  ;;  %p1399_p4 = por %p1398_p2, %p1397_p1 }
  0x6e   : > { %p1393_p13 = pneg %p1392_p11 }
  0x70   : > { %p1400_p8 = pnand %p1399_p4, %p1393_p13 }
  0x72   : > { %1403 = shalt.err (!%p1400_p8)
}
  0x73   : > { %1206 = dma.hbm_to_vmem [thread:$0]  (!%p1751_p10), %s2172_s7, 512, %s381_s26, [#allocation9], %s1605_s11, %s1605_s11, %s1606_s17  }
  0x74   : > { %s42_s10 = sadd.s32 1, %s1592_s22  ;;  %s45_s13 = sadd.s32 1, %s1596_s23 }
  0x75   : > { %p43_p4 = scmp.ge.s32.totalorder %s42_s10, 2  ;;  %s54_s8 = sadd.s32 1, %s1580_s19 }
  0x76   : > { %p61_p8 = scmp.ne.s32.totalorder %s1580_s19, %s1576_s18  ;;  %p62_p12 = scmp.eq.s32.totalorder %s1600_s24, 0 }
  0x77   : > { %s2205_s10 = smov (%p43_p4, %s42_s10), 0  ;;  %s2207_s13 = smov (!%p43_p4, %s45_s13), %s1596_s23 }
  0x78   : > { %s50_s20 = ssub.s32 %s1592_s22, %s2205_s10  ;;  %p47_p6 = scmp.ge.s32.totalorder %s2207_s13, 2 }
  0x79   : > { %p2173_p0 = scmp.eq.s32.totalorder %s1720_s25, 3  ;;  %p1856_p10 = por %p62_p12, %p61_p8 }
  0x7a   : > { %p1224_p5 = scmp.lt.s32.totalorder %s1600_s24, 4  ;;  %s2209_s13 = smov (%p47_p6, %s2207_s13), 0 }
  0x7b   : > { %p1852_p3 = por %p2173_p0, %p61_p8  ;;  %s397_s11 = sand.u32 1, %s1580_s19  }
  0x7c   : > { %s1070_s17 = sshll.u32 %s1596_s23, 1  ;;  %s49_s28 = ssub.s32 %s1596_s23, %s2209_s13 }
  0x7d   : > { %s51_s30 = sor.u32 %s50_s20, %s49_s28  ;;  %s1069_s14 = sshll.u32 %s397_s11, 3 }
  0x7e   : > { %p52_p7 = scmp.eq.s32.totalorder %s51_s30, 0  ;;  %s406_s16 = sadd.s32 %s1592_s22, %s1070_s17 }
  0x7f   : > { %s401_s9 = scalar_lea.vmem [#allocation2], %s1069_s14  ;;  %s1071_s6 = sshll.u32 %s406_s16, 7 }
  0x80   : > { %s410_s12 = sshll.u32 %s401_s9, 4  ;;  %s1876_s7 = scalar_lea.hbm %s2130_s0, %s1071_s6  ;;  %s1871_s12 = int_to_ptr.vmem [resolvable:$true] %s410_s12 }
  0x81   : > { %s1869_s15 = scalar_select %p52_p7, %s1580_s19, %s54_s8  }
  0x82   : > { %p1882_p9 = pnand %p1224_p5, %p1856_p10  ;;  %s398_s8 = scalar_lea.sflag [#allocation3], %s397_s11 }
  0x83   : > { %s1404_s17 = scalar_lea.hbm %s1876_s7, 128  ;;  %s1409_s26 = scalar_lea.hbm %s2130_s0, 512 }
  0x84   : > { %p1405_p11 = scmp.ne.s32.totalorder %s1876_s7, %s1404_s17  ;;  %p1406_p13 = pneg %p1882_p9 }
  0x85   : > { %p1410_p4 = scmp.lt.u32.totalorder %s1876_s7, %s2130_s0  ;;  %p1411_p8 = scmp.lt.u32.totalorder %s1409_s26, %s1404_s17 }
  0x86   : > { %p1407_p1 = pnand %p1406_p13, %p1405_p11  ;;  %p1413_p6 = scmp.lt.u32.totalorder %s1404_s17, %s1876_s7 }
  0x87   : > { %p1412_p12 = por %p1411_p8, %p1410_p4 }
  0x88   : > { %p1408_p2 = pneg %p1407_p1 }
  0x89   : > { %p1414_p0 = por %p1413_p6, %p1412_p12 }
  0x8b   : > { %p1415_p10 = pnand %p1414_p0, %p1408_p2 }
  0x8d   : > { %1418 = shalt.err (!%p1415_p10)
}
  0x8e   : > { %s1419_s11 = scalar_lea.vmem %s1871_s12, 128  ;;  %s1607_s14 = smov [#allocation2]  }
  0x8f   : > { %p1420_p5 = scmp.ne.s32.totalorder %s1871_s12, %s1419_s11  ;;  %s1424_s16 = sshll.u32 %s1607_s14, 4  ;;  %s1425_s16 = int_to_ptr.vmem [resolvable:$false] %s1424_s16 }
  0x90   : > { %s1426_s9 = scalar_lea.vmem %s1425_s16, 256  ;;  %p1427_p1 = scmp.lt.s32.totalorder %s1871_s12, %s1425_s16 }
  0x91   : > { %p1422_p7 = pnand %p1420_p5, %p1406_p13  ;;  %p1428_p4 = scmp.lt.s32.totalorder %s1426_s9, %s1419_s11 }
  0x93   : > { %p1423_p11 = pneg %p1422_p7  ;;  %p1429_p8 = por %p1428_p4, %p1427_p1 }
  0x95   : > { %p1430_p12 = pnand %p1429_p8, %p1423_p11 }
  0x97   : > { %1433 = shalt.err (!%p1430_p12)
}
  0x98   : > { %1210 = dma.hbm_to_vmem [thread:$0]  (!%p1882_p9), %s1876_s7, 128, %s1871_s12, %s398_s8  }
  0x99   : > { %p2177_p2 = scmp.ne.s32.totalorder %s2167_s29, 0 }
  0x9a   : > { %s1914_s6 = sand.u32 (!%p2177_p2), 1, %s1576_s18   ;;  %p2178_p13 = scmp.ne.s32.totalorder (!%p2177_p2), %s2164_s27, 0 }
  0x9b   : > { %419 = sbr.rel (%p2177_p2) target bundleno = 884 (0x374), region = 56  ;;  %s1073_s17 = sshll.u32 (!%p2177_p2), %s1914_s6, 3 }
  0x9c   : > { %s422_s3 = scalar_lea.sflag (!%p2177_p2), [#allocation3], %s1914_s6  ;;  %s425_s5 = scalar_lea.vmem (!%p2177_p2), [#allocation2], %s1073_s17 }
  0xa2   : > { %1551 = dma.done.wait (%p2178_p13), %s422_s3, 128  }
  0xa3   : > { %1553 = vsyncadd (%p2178_p13), %s422_s3, 4294967168  ;;  %p2179_p6 = scmp.eq.s32.totalorder %s1720_s25, 0 }
  0xa5   : > { %1555 = dma.done.wait (%p2179_p6), [#allocation6], 1024   ;;  %p2180_p9 = pmov %p2179_p6 }
  0xa6   : > { %p2181_p0 = pmov %p2179_p6 }
  0xa7   : > { %1557 = vsyncadd (%p2180_p9), [#allocation6], 4294966272 }
  0xa8   : > { %1559 = dma.done.wait (%p2181_p0), [#allocation9], 512   ;;  %p2182_p10 = pmov %p2181_p0 }
  0xa9   : > { %vm490_vm0 = vcmask 523264   ;;  %v487_v0 = vld [vmem:[%s425_s5] sm:$0xff]  ;;  %v1306_v7 = vld [vmem:[#allocation5] sm:$0xff]   ;;  %v1608_v9 = vmov 0.0   ;;  %v1308_v10 = vld [vmem:[#allocation5 + $0x8] sm:$0xff]   ;;  %vm1609_vm1 = vmmov 0  }
  0xaa   : > { %1561 = vsyncadd (%p2182_p10), [#allocation9], 4294966784  ;;  %v491_v1 = vsel %vm490_vm0, %v487_v0, 0.0  ;;  %v1307_v8 = vld [vmem:[#allocation7] sm:$0xff]   ;;  %1141 = vmatprep.subr.bf16.mxu0 %v1608_v9  ;;  %1153 = vmatprep.subr.bf16.mxu1 %v1608_v9  ;;  %v1309_v11 = vld [vmem:[#allocation7 + $0x8] sm:$0xff]   ;;  %s1945_s20 = sshll.u32 %s1914_s6, 4 }
  0xab   : > { %492 = vadd.xlane.f32.xlu0 %v491_v1  ;;  %1142 = vmatpush3.bf16.msra.mxu0 %v1306_v7  ;;  %v1310_v12 = vld [vmem:[#allocation5 + $0x10] sm:$0xff]   ;;  %v1312_v14 = vld [vmem:[#allocation5 + $0x18] sm:$0xff]   ;;  %v1314_v25 = vld [vmem:[#allocation8] sm:$0xff]   ;;  %s2183_s11 = sld [smem:[#allocation25_spill]]  ;;  %vm603_vm2 = vcmask 125952   ;;  %s1954_s14 = scalar_lea.vmem [#allocation10], %s1945_s20 }
  0xac   : > { %1154 = vmatpush3.bf16.msra.mxu1 %v1307_v8  ;;  %1143 = vmatprep.subr.bf16.mxu0 %v1608_v9  ;;  %v1311_v13 = vld [vmem:[#allocation7 + $0x10] sm:$0xff]   ;;  %v1313_v15 = vld [vmem:[#allocation7 + $0x18] sm:$0xff]   ;;  %v1315_v27 = vld [vmem:[#allocation8 + $0x8] sm:$0xff]   ;;  %s1959_s16 = scalar_lea.vmem [#allocation11], %s1945_s20  ;;  %s1610_s9 = smov 80  }
  0xad   : > { %1155 = vmatprep.subr.bf16.mxu1 %v1608_v9  ;;  %1149 = vmatprep.mubr.msk.bf16.mxu0 %vm1609_vm1, %v1608_v9  ;;  %v1080_v20 = vld [vmem:[%s2131_s1] ss:$0 sm:$0xff]  ;;  %v1317_v29 = vld [vmem:[#allocation8 + $0x18] sm:$0xff]   ;;  %s1611_s17 = smov 112   ;;  %s1612_s3 = smov 96  }
  0xae   : > { %1161 = vmatprep.mubr.msk.bf16.mxu1 %vm1609_vm1, %v1608_v9  ;;  %v1081_v22 = vld [vmem:[%s2132_s2] ss:$0 sm:$0xff]  ;;  %s2184_s5 = sld [smem:[#allocation21_spill]]  ;;  %s2185_s29 = sld [smem:[#allocation27_spill]] }
  0xaf   : > { %1144 = vmatpush3.bf16.msra.mxu0 %v1308_v10  ;;  %v1316_v28 = vld [vmem:[#allocation8 + $0x10] sm:$0xff]   ;;  %s2186_s12 = sld [smem:[#allocation20_spill]]  ;;  %s1967_s8 = scalar_lea.vmem [#allocation13], %s1945_s20 }
  0xb0   : > { %1156 = vmatpush3.bf16.msra.mxu1 %v1309_v11  ;;  %1145 = vmatprep.subr.bf16.mxu0 %v1608_v9  ;;  %v1082_v30 = vld [vmem:[%s2134_s4] ss:$0 sm:$0xff]  ;;  %s863_s30 = sshll.u32 %s1959_s16, 4  ;;  %s1977_s30 = int_to_ptr.vmem [resolvable:$true] %s863_s30 }
  0xb1   : > { %1157 = vmatprep.subr.bf16.mxu1 %v1608_v9  ;;  %v1092_v31 = vld [vmem:[%s2183_s11] ss:$0 sm:$0xff]  ;;  %s826_s11 = sand.u32 1, %s1720_s25   ;;  %s1434_s27 = scalar_lea.vmem %s1977_s30, 256 }
  0xb2   : > { %s1991_s25 = scalar_lea.sflag [#allocation12], %s826_s11  ;;  %p1435_p5 = scmp.ne.s32.totalorder %s1977_s30, %s1434_s27 }
  0xb3   : > { %1146 = vmatpush3.bf16.msra.mxu0 %v1310_v12 }
  0xb4   : > { %1158 = vmatpush3.bf16.msra.mxu1 %v1311_v13  ;;  %1147 = vmatprep.subr.bf16.mxu0 %v1608_v9  ;;  %v1102_v44 = vld [vmem:[%s2185_s29] ss:$0 sm:$0xff]  ;;  %s1115_s26 = sshll.u32 %s2184_s5, 3  ;;  %p1436_p7 = pnand %p1435_p5, %p1852_p3 }
  0xb5   : > { %1159 = vmatprep.subr.bf16.mxu1 %v1608_v9  ;;  %s843_s28 = sadd.s32 %s2186_s12, %s1115_s26  ;;  %s1613_s29 = smov [#allocation11]  }
  0xb6   : > { %s1975_s7 = sshll.u32 %s843_s28, 6  ;;  %p1437_p11 = pneg %p1436_p7 }
  0xb7   : > { %1148 = vmatpush3.bf16.msra.mxu0 %v1312_v14  ;;  %s1438_s12 = sshll.u32 %s1613_s29, 4  ;;  %s1439_s12 = int_to_ptr.vmem [resolvable:$false] %s1438_s12 }
  0xb8   : > { %1160 = vmatpush3.bf16.msra.mxu1 %v1313_v15  ;;  %1165 = vmatprep.subr.bf16.mxu0 %v1608_v9  ;;  %s1440_s26 = scalar_lea.vmem %s1439_s12, 512  ;;  %p1441_p1 = scmp.lt.s32.totalorder %s1977_s30, %s1439_s12 }
  0xb9   : > { %p1442_p4 = scmp.lt.s32.totalorder %s1440_s26, %s1434_s27 }
  0xbb   : > { %p1443_p8 = por %p1442_p4, %p1441_p1 }
  0xbd   : > { %p1444_p12 = pnand %p1443_p8, %p1437_p11 }
 0x138   : > { %v493_v2 = vpop.xlane.xlu0 %492 }
 0x139   : > { %v495_v3 = vmul.f32 0.015625, %v493_v2 }
 0x13b   : > { %v496_v4 = vsub.f32 %v487_v0, %v495_v3 }
 0x13d   : > { %v497_v5 = vmul.f32 %v496_v4, %v496_v4 }
 0x13f   : > { %v498_v6 = vsel %vm490_vm0, %v497_v5, 0.0 }
 0x140   : > { %499 = vadd.xlane.f32.xlu0 %v498_v6 }
 0x1cd   : > { %v500_v16 = vpop.xlane.xlu0 %499 }
 0x1ce   : > { %v501_v17 = vmul.f32 0.015625, %v500_v16 }
 0x1d0   : > { %v502_v18 = vadd.f32 1e-05, %v501_v17 }
 0x1d2   : > { %1318 = vrsqrt.f32 %v502_v18 }
 0x1dc   : > { %v1319_v19 = vpop.eup %1318 }
 0x1dd   : > { %v504_v21 = vmul.f32 %v1319_v19, %v496_v4 }
 0x1df   : > { %v511_v23 = vmul.f32 %v1080_v20, %v504_v21 }
 0x1e1   : > { %v518_v24 = vadd.f32 %v1081_v22, %v511_v23 }
 0x1e3   : > { %v519_v26 = vpack.c.bf16 %v518_v24, %v518_v24 }
 0x1e5   : > { %1150 = vmatmul.mubr.msk.bf16.vlgmr.msra.gmra.mrb[0].mxu0 %vm490_vm0, %v519_v26  ;;  %1162 = vmatmul.mubr.msk.bf16.vlgmr.msra.gmra.mrb[0].mxu1 %vm490_vm0, %v519_v26 }
 0x1e6   : > { %1166 = vmatpush3.bf16.msra.mxu0 %v1314_v25  ;;  %1173 = vmatprep.mubr.msk.bf16.mxu0 %vm1609_vm1, %v1608_v9 }
 0x1e7   : > { %1167 = vmatprep.subr.bf16.mxu0 %v1608_v9 }
 0x1ea   : > { %1168 = vmatpush3.bf16.msra.mxu0 %v1315_v27 }
 0x1eb   : > { %1169 = vmatprep.subr.bf16.mxu0 %v1608_v9 }
 0x1ee   : > { %1170 = vmatpush3.bf16.msra.mxu0 %v1316_v28 }
 0x1ef   : > { %1171 = vmatprep.subr.bf16.mxu0 %v1608_v9 }
 0x1f2   : > { %1172 = vmatpush3.bf16.msra.mxu0 %v1317_v29 }
 0x1f5   : > { %1174 = vmatmul.mubr.msk.bf16.vlgmr.msra.gmra.mrb[4].mxu0 %vm490_vm0, %v519_v26 }
 0x2b8   : > { %v596_v32 = vpop.f32.mrb[0].mxu0  ;;  %v696_v33 = vpop.f32.mrb[0].mxu1 }
 0x2b9   : > { %v597_v34 = vadd.f32 %v1082_v30, %v596_v32  ;;  %v697_v35 = vadd.f32 %v1092_v31, %v696_v33  ;;  %v1151_v36 = vpop.f32.mrb[1].mxu0  ;;  %v1163_v37 = vpop.f32.mrb[1].mxu1 }
 0x2ba   : > { %v599_v38 = vpop.f32.mrb[2].mxu0  ;;  %v699_v39 = vpop.f32.mrb[2].mxu1 }
 0x2bb   : > { %v602_v40 = vpack.c.bf16 %v597_v34, %v597_v34  ;;  %v702_v41 = vpack.c.bf16 %v697_v35, %v697_v35  ;;  %v1152_v42 = vpop.f32.mrb[3].mxu0  ;;  %v1164_v43 = vpop.f32.mrb[3].mxu1 }
 0x2bd   : > { %604 = vst.msk [vmem:[%s1954_s14] sm:$0xf] %vm603_vm2, %v602_v40  ;;  %703 = vst.msk [vmem:[%s1959_s16] sm:$0xf] %vm603_vm2, %v702_v41  ;;  %717 = vrot.lane.b32.xlu0 %v702_v41, %s1610_s9  ;;  %707 = vrot.lane.b32.xlu1 %v702_v41, %s1611_s17 }
 0x2c1   : > { %712 = vrot.lane.b32.xlu1 %v702_v41, %s1612_s3 }
 0x2c5   : > { %608 = vrot.lane.b32.xlu1 %v602_v40, %s1611_s17 }
 0x2c8   : > { %v795_v45 = vpop.f32.mrb[4].mxu0 }
 0x2c9   : > { %v796_v46 = vadd.f32 %v1102_v44, %v795_v45  ;;  %v1175_v47 = vpop.f32.mrb[5].mxu0  ;;  %613 = vrot.lane.b32.xlu1 %v602_v40, %s1612_s3 }
 0x2ca   : > { %v798_v48 = vpop.f32.mrb[6].mxu0 }
 0x2cb   : > { %v801_v49 = vpack.c.bf16 %v796_v46, %v796_v46  ;;  %v1176_v50 = vpop.f32.mrb[7].mxu0 }
 0x2cd   : > { %802 = vst.msk [vmem:[%s1967_s8] sm:$0xf] %vm603_vm2, %v801_v49  ;;  %618 = vrot.lane.b32.xlu1 %v602_v40, %s1610_s9 }
 0x2d1   : > { %806 = vrot.lane.b32.xlu1 %v801_v49, %s1611_s17  ;;  %s2187_s17 = sld [smem:[#allocation29_spill]] }
 0x2d5   : > { %811 = vrot.lane.b32.xlu1 %v801_v49, %s1612_s3 }
 0x2d7   : > { %s2188_s3 = smov %s2187_s17  ;;  %s1987_s5 = scalar_lea.hbm %s2187_s17, %s1975_s7 }
 0x2d9   : > { %816 = vrot.lane.b32.xlu1 %v801_v49, %s1610_s9 }
 0x32f   : > { %v718_v51 = vpop.permute.xlu0 %717  ;;  %v708_v52 = vpop.permute.xlu1 %707 }
 0x330   : > { %1101 = vst.msk [vmem:[%s1959_s16 + $0xc] sm:$0xf] %vm603_vm2, %v718_v51  ;;  %1099 = vst.msk [vmem:[%s1959_s16 + $0x4] sm:$0xf] %vm603_vm2, %v708_v52 }
 0x333   : > { %v713_v53 = vpop.permute.xlu1 %712 }
 0x334   : > { %1100 = vst.msk [vmem:[%s1959_s16 + $0x8] sm:$0xf] %vm603_vm2, %v713_v53 }
 0x335   : > { %1447 = shalt.err (!%p1444_p12)
}
 0x336   : > { %s1448_s16 = scalar_lea.hbm %s1987_s5, 256  ;;  %s1452_s20 = scalar_lea.hbm %s2188_s3, 1024 }
 0x337   : > { %p1449_p2 = scmp.ne.s32.totalorder %s1987_s5, %s1448_s16  ;;  %p1453_p9 = scmp.lt.u32.totalorder %s1987_s5, %s2188_s3 }
 0x338   : > { %p1454_p0 = scmp.lt.u32.totalorder %s1452_s20, %s1448_s16  ;;  %p1456_p5 = scmp.lt.u32.totalorder %s1448_s16, %s1987_s5 }
 0x339   : > { %p1450_p13 = pnand %p1449_p2, %p1852_p3 }
 0x33a   : > { %p1455_p10 = por %p1454_p0, %p1453_p9 }
 0x33b   : > { %p1451_p6 = pneg %p1450_p13 }
 0x33c   : > { %p1457_p7 = por %p1456_p5, %p1455_p10 }
 0x33e   : > { %p1458_p11 = pnand %p1457_p7, %p1451_p6 }
 0x340   : > { %1461 = shalt.err (!%p1458_p11)
}
 0x341   : > { %s2151_s27 = smov 64   ;;  %s1615_s29 = smov 128   ;;  %v609_v54 = vpop.permute.xlu1 %608 }
 0x342   : > { %s1616_s12 = smov 4   ;;  %1089 = vst.msk [vmem:[%s1954_s14 + $0x4] sm:$0xf] %vm603_vm2, %v609_v54  ;;  %s846_s26 = sshll.u32 %s1954_s14, 4  ;;  %s2023_s26 = int_to_ptr.vmem [resolvable:$true] %s846_s26 }
 0x343   : > { %1192 = dma.vmem_to_hbm [thread:$0]  (%p1852_p3), %s1977_s30, 256, %s1987_s5, %s1991_s25, %s2151_s27, %s1615_s29, %s1616_s12  }
 0x344   : > { %s2189_s11 = sld [smem:[#allocation28_spill]]  ;;  %s1462_s5 = scalar_lea.vmem %s2023_s26, 256 }
 0x345   : > { %v614_v55 = vpop.permute.xlu1 %613  ;;  %p1463_p1 = scmp.ne.s32.totalorder %s2023_s26, %s1462_s5  ;;  %s1617_s9 = smov [#allocation10]  }
 0x346   : > { %1090 = vst.msk [vmem:[%s1954_s14 + $0x8] sm:$0xf] %vm603_vm2, %v614_v55  ;;  %s1466_s17 = sshll.u32 %s1617_s9, 4  ;;  %s1467_s17 = int_to_ptr.vmem [resolvable:$false] %s1466_s17 }
 0x347   : > { %p1464_p4 = pnand %p1463_p1, %p1852_p3  ;;  %s1468_s27 = scalar_lea.vmem %s1467_s17, 512 }
 0x348   : > { %p1469_p12 = scmp.lt.s32.totalorder %s2023_s26, %s1467_s17  ;;  %p1470_p2 = scmp.lt.s32.totalorder %s1468_s27, %s1462_s5 }
 0x349   : > { %v619_v56 = vpop.permute.xlu1 %618  ;;  %p1465_p8 = pneg %p1464_p4 }
 0x34a   : > { %s2029_s20 = scalar_lea.hbm %s2189_s11, %s1975_s7  ;;  %1091 = vst.msk [vmem:[%s1954_s14 + $0xc] sm:$0xf] %vm603_vm2, %v619_v56  ;;  %p1471_p13 = por %p1470_p2, %p1469_p12 }
 0x34c   : > { %p1472_p6 = pnand %p1471_p13, %p1465_p8 }
 0x34e   : > { %1475 = shalt.err (!%p1472_p6)
}
 0x34f   : > { %s1476_s14 = scalar_lea.hbm %s2029_s20, 256  ;;  %s1480_s9 = scalar_lea.hbm %s2189_s11, 1024 }
 0x350   : > { %p1477_p9 = scmp.ne.s32.totalorder %s2029_s20, %s1476_s14  ;;  %p1481_p5 = scmp.lt.u32.totalorder %s2029_s20, %s2189_s11 }
 0x351   : > { %p1482_p7 = scmp.lt.u32.totalorder %s1480_s9, %s1476_s14  ;;  %p1484_p1 = scmp.lt.u32.totalorder %s1476_s14, %s2029_s20 }
 0x352   : > { %p1478_p0 = pnand %p1477_p9, %p1852_p3 }
 0x353   : > { %p1483_p11 = por %p1482_p7, %p1481_p5 }
 0x354   : > { %p1479_p10 = pneg %p1478_p0 }
 0x355   : > { %p1485_p4 = por %p1484_p1, %p1483_p11 }
 0x357   : > { %p1486_p8 = pnand %p1485_p4, %p1479_p10 }
 0x359   : > { %1489 = shalt.err (!%p1486_p8)
}
 0x35a   : > { %s2190_s27 = smov 64   ;;  %s2191_s5 = scalar_lea.sflag [#allocation4], %s1914_s6  ;;  %v807_v57 = vpop.permute.xlu1 %806 }
 0x35b   : > { %1191 = dma.vmem_to_hbm [thread:$0]  (%p1852_p3), %s2023_s26, 256, %s2029_s20, %s2191_s5, %s2190_s27, %s1615_s29, %s1616_s12  }
 0x35c   : > { %1109 = vst.msk [vmem:[%s1967_s8 + $0x4] sm:$0xf] %vm603_vm2, %v807_v57  ;;  %s880_s30 = sshll.u32 %s1967_s8, 4  ;;  %s2192_s16 = sld [smem:[#allocation30_spill]]  ;;  %s2065_s30 = int_to_ptr.vmem [resolvable:$true] %s880_s30 }
 0x35d   : > { %s1490_s26 = scalar_lea.vmem %s2065_s30, 256  ;;  %s1618_s20 = smov [#allocation13]  }
 0x35e   : > { %v812_v58 = vpop.permute.xlu1 %811  ;;  %p1491_p12 = scmp.ne.s32.totalorder %s2065_s30, %s1490_s26  ;;  %s1494_s9 = sshll.u32 %s1618_s20, 4  ;;  %s1495_s9 = int_to_ptr.vmem [resolvable:$false] %s1494_s9 }
 0x35f   : > { %1110 = vst.msk [vmem:[%s1967_s8 + $0x8] sm:$0xf] %vm603_vm2, %v812_v58  ;;  %s1496_s17 = scalar_lea.vmem %s1495_s9, 512  ;;  %p1497_p6 = scmp.lt.s32.totalorder %s2065_s30, %s1495_s9 }
 0x360   : > { %p1492_p2 = pnand %p1491_p12, %p1852_p3  ;;  %p1498_p9 = scmp.lt.s32.totalorder %s1496_s17, %s1490_s26 }
 0x362   : > { %s2071_s28 = scalar_lea.hbm %s2192_s16, %s1975_s7  ;;  %v817_v59 = vpop.permute.xlu1 %816  ;;  %p1493_p13 = pneg %p1492_p2 }
 0x363   : > { %1111 = vst.msk [vmem:[%s1967_s8 + $0xc] sm:$0xf] %vm603_vm2, %v817_v59  ;;  %p1499_p0 = por %p1498_p9, %p1497_p6 }
 0x365   : > { %p1500_p10 = pnand %p1499_p0, %p1493_p13 }
 0x367   : > { %1503 = shalt.err (!%p1500_p10)
}
 0x368   : > { %s1504_s8 = scalar_lea.hbm %s2071_s28, 256  ;;  %s1508_s14 = scalar_lea.hbm %s2192_s16, 1024 }
 0x369   : > { %p1505_p5 = scmp.ne.s32.totalorder %s2071_s28, %s1504_s8  ;;  %p1509_p1 = scmp.lt.u32.totalorder %s2071_s28, %s2192_s16 }
 0x36a   : > { %p1510_p4 = scmp.lt.u32.totalorder %s1508_s14, %s1504_s8  ;;  %p1512_p12 = scmp.lt.u32.totalorder %s1504_s8, %s2071_s28 }
 0x36b   : > { %p1506_p7 = pnand %p1505_p5, %p1852_p3 }
 0x36c   : > { %p1511_p8 = por %p1510_p4, %p1509_p1 }
 0x36d   : > { %p1507_p11 = pneg %p1506_p7 }
 0x36e   : > { %p1513_p2 = por %p1512_p12, %p1511_p8 }
 0x370   : > { %p1514_p13 = pnand %p1513_p2, %p1507_p11 }
 0x372   : > { %1517 = shalt.err (!%p1514_p13)
}
 0x373   : > { %1193 = dma.vmem_to_hbm [thread:$0]  (%p1852_p3), %s2065_s30, 256, %s2071_s28, %s1991_s25, %s2190_s27, %s1615_s29, %s1616_s12  }
 0x374 PF: > { %s2193_s26 = sld [smem:[#allocation19_spill]]  ;;  %s2194_s9 = sld [smem:[#allocation22_spill]] }
 0x375   : > { %p1228_p6 = scmp.ge.s32.totalorder %s1600_s24, 2 }
 0x37a   : > { %s895_s17 = sand.u32 1, %s2193_s26   ;;  %p2195_p9 = scmp.ne.s32.totalorder %s2194_s9, 0 }
 0x37b   : > { %s896_s8 = scalar_lea.sflag [#allocation4], %s895_s17 }
 0x37c   : > { %p1212_p0 = pnand %p1228_p6, %p2195_p9 }
 0x37e   : > { %1563 = dma.done.wait (!%p1212_p0), %s896_s8, 256  }
 0x37f   : > { %1565 = vsyncadd (!%p1212_p0), %s896_s8, 4294967040  ;;  %s2196_s21 = sadd.s32 4294967294, %s1600_s24  }
 0x380   : > { %s904_s7 = sand.u32 1, %s2196_s21  }
 0x381   : > { %s905_s5 = scalar_lea.sflag [#allocation12], %s904_s7 }
 0x382   : > { %1567 = dma.done.wait (!%p1212_p0), %s905_s5, 512  }
 0x383   : > { %1569 = vsyncadd (!%p1212_p0), %s905_s5, 4294966784  ;;  %s33_s24 = sadd.s32 1, %s1600_s24   ;;  %s2197_s17 = smov %s1576_s18 }
 0x384   : > { %p30_p3 = scmp.ge.s32.totalorder %s33_s24, 6   ;;  %s2198_s18 = smov %s1580_s19 }
 0x385   : > { %s2199_s19 = smov %s1869_s15  ;;  %s2200_s20 = smov %s1592_s22 }
 0x386   : > { %s2201_s21 = smov %s1596_s23  ;;  %s2202_s22 = smov %s2205_s10 }
 0x387   : > { %s2203_s23 = smov %s2209_s13  ;;  %32 = sbr.rel (!%p30_p3) target bundleno = 20 (0x14), region = 154 }
 0x38e   :  { %919 = vsyncpa [#allocation3], 1 }
 0x38f   :  { %921 = vsyncpa [#allocation3 + $0x1], 1 }
 0x390   :  { %922 = vsyncpa [#allocation6], 1 }
 0x391   :  { %923 = vsyncpa [#allocation9], 1 }
 0x392   :  { %924 = vsyncpa [#allocation4], 1 }
 0x393   :  { %926 = vsyncpa [#allocation4 + $0x1], 1 }
 0x394   :  { %927 = vsyncpa [#allocation12], 1 }
 0x395   :  { %929 = vsyncpa [#allocation12 + $0x1], 1 }

</bundles_post_ra>
